<compile_context>
chip_gen: v7x
topology: tpu7x:2x2x1
jax: 0.10.0
libtpu: 0.0.40
codegen_flags: <defaults>
</compile_context>

<pallas_src>
import jax
import jax.numpy as jnp
from jax.experimental import pallas as pl
from jax.experimental.pallas import tpu as pltpu


# ---------------------------------------------------------------------------
# Kernels
# ---------------------------------------------------------------------------
def _proj_loss_gram_kernel(qt_ref, g_ref, v_ref, o_ref, acc_ref):
    # qt_ref: (TB, k, D)  g_ref: (TB, k, k) f32  v_ref: (TB, D, TK)
    # o_ref : (TB, 1) f32 (resident over the K axis)
    # acc   : (TB, TK) f32 lane-dense per-column-norm accumulator (scratch).
    @pl.when(pl.program_id(1) == 0)
    def _init():
        acc_ref[...] = jnp.zeros_like(acc_ref)

    qt = qt_ref[...]                       # native dtype -> MXU operand
    v = v_ref[...]
    vf = v.astype(jnp.float32)

    # y = Q^T v  (k x TK per batch element), f32 accumulation on the MXU.
    y = jnp.einsum("bkd,bdn->bkn", qt, v, preferred_element_type=jnp.float32)
    # G y  (k x TK), tiny f32 matmul (G = Q^T Q, precomputed in the wrapper).
    gy = jnp.einsum("bkj,bjn->bkn", g_ref[...], y,
                    preferred_element_type=jnp.float32)

    v_sq = jnp.sum(vf * vf, axis=1)        # ||v_j||^2       (TB, TK)
    y_sq = jnp.sum(y * y, axis=1)          # ||y_j||^2       (TB, TK)
    quad = jnp.sum(y * gy, axis=1)         # y_j^T G y_j     (TB, TK)

    # ||v - Q y||^2 = ||v||^2 - 2||y||^2 + y^T G y ; clamp (roundoff can go <0).
    r_sq = jnp.maximum(v_sq - 2.0 * y_sq + quad, 0.0)
    acc_ref[...] += jnp.sqrt(r_sq)         # column L2 norms (p=2, dim=1)

    @pl.when(pl.program_id(1) == pl.num_programs(1) - 1)
    def _finalize():
        # Single cross-lane reduce + narrow store per batch tile.
        o_ref[...] = jnp.sum(acc_ref[...], axis=-1, keepdims=True)


def _proj_loss_exact_kernel(qt_ref, q_ref, v_ref, o_ref, acc_ref):
    # Exact residual fallback (no Gram cancellation).  Materializes the
    # (TB, D, TK) residual, so it needs smaller tiles than the Gram path.
    @pl.when(pl.program_id(1) == 0)
    def _init():
        acc_ref[...] = jnp.zeros_like(acc_ref)

    qt = qt_ref[...]
    q = q_ref[...]
    v = v_ref[...]

    y = jnp.einsum("bkd,bdn->bkn", qt, v, preferred_element_type=jnp.float32)
    # Note: for bf16 inputs y is downcast before the second matmul (matches
    # typical torch bf16 bmm behavior; small deviation from an all-f32 ref).
    qqy = jnp.einsum("bdk,bkn->bdn", q, y.astype(q.dtype),
                     preferred_element_type=jnp.float32)
    r = v.astype(jnp.float32) - qqy
    acc_ref[...] += jnp.sqrt(jnp.sum(r * r, axis=1))

    @pl.when(pl.program_id(1) == pl.num_programs(1) - 1)
    def _finalize():
        o_ref[...] = jnp.sum(acc_ref[...], axis=-1, keepdims=True)


# ---------------------------------------------------------------------------
# Generation-aware VMEM budget
# ---------------------------------------------------------------------------
def _vmem_capacity_bytes():
    try:
        cap = int(pltpu.get_tpu_info().vmem_capacity_bytes)
        if cap > 0:
            return cap
    except Exception:
        pass
    return 64 * 1024 * 1024        # conservative (v7x per-TC VMEM)


def _choose_tiles(B, D, k, K, itemsize, budget, exact):
    """Pick (TB, TK): TK a multiple of 128; TB == B (small B) or a multiple of 8."""
    if exact:
        resident = 4 * D * k * itemsize                      # Q + Qt, double-buffered
    else:
        resident = 2 * D * k * itemsize + 2 * k * k * 4      # Qt (x2) + G (x2, f32)

    def per_elt(tk):
        v_tile = 2 * D * tk * itemsize                       # V, double-buffered
        if exact:
            inter = 4 * (3 * D * tk + 2 * k * tk)            # qqy, vf, r + y, norms
        else:
            inter = 4 * (D * tk + 4 * k * tk + 4 * tk)       # v^2 pass + y/gy + rows
        return resident + v_tile + inter + 4 * tk            # + acc scratch row

    k128 = -(-K // 128) * 128
    cands = []
    for c in (min(k128, 2048), 1024, 512, 256, 128):
        if c <= k128 and c not in cands:
            cands.append(c)
    tk = cands[-1]
    for c in cands:                                          # largest that fits
        if per_elt(c) <= budget:
            tk = c
            break

    tb = max(1, budget // max(per_elt(tk), 1))
    tb = min(tb, B)
    if B >= 16:
        tb = min(tb, B // 2)            # >= 2 batch grid steps (v7x megacore split)
        tb = max(8, (tb // 8) * 8)      # (TB, 1) output block needs 8-aligned rows
        while tk > 128 and tb * per_elt(tk) > budget:
            tk -= 128
        # TODO(synk): for extremely large untiled D the footprint can still exceed
        # VMEM; a D grid axis with a squared-norm accumulator would be needed.
    else:
        tb = B                          # single batch step; block == full array dim
        while tk > 128 and tb * per_elt(tk) > budget:
            tk -= 128
    return int(tb), int(tk)


# ---------------------------------------------------------------------------
# Wrapper
# ---------------------------------------------------------------------------
def projection_loss(Q, V, reduction="mean", *, exact=False, stream_dtype=None):
    """Q: [B, D, k], V: [B, D, K]. Returns scalar loss (f32) for mean/sum.

    exact=False  -> Gram-identity path (default, smaller working set).
    exact=True   -> exact residual path (no cancellation).
    stream_dtype -> optional HBM-stream dtype (e.g. jnp.bfloat16) for f32 inputs;
                    halves the dominant V traffic (accuracy-tolerance decision).
    """
    assert Q.shape[-2] == V.shape[-2], "dim mismatch between Q and V"
    assert Q.shape[0] == V.shape[0], "batch mismatch between Q and V"
    B, D, k = Q.shape
    K = V.shape[-1]

    Qs = Q.astype(stream_dtype) if stream_dtype is not None else Q
    Vs = V.astype(stream_dtype) if stream_dtype is not None else V
    itemsize = jnp.dtype(Qs.dtype).itemsize

    vmem_cap = _vmem_capacity_bytes()
    budget = (vmem_cap * 5) // 16          # ~20 MiB on v7x, ~40 MiB on v5e/v6e
    vmem_limit = (vmem_cap * 5) // 8       # ~40 MiB on v7x, ~80 MiB on v5e/v6e

    TB, TK = _choose_tiles(B, D, k, K, itemsize, budget, exact)
    B_pad = -(-B // TB) * TB
    K_pad = -(-K // TK) * TK

    # Zero padding is loss-neutral (zero columns / zero batch rows -> zero norm).
    if B_pad != B:
        Qs = jnp.pad(Qs, ((0, B_pad - B), (0, 0), (0, 0)))
        Vs = jnp.pad(Vs, ((0, B_pad - B), (0, 0), (0, 0)))
    if K_pad != K:
        Vs = jnp.pad(Vs, ((0, 0), (0, 0), (0, K_pad - K)))
    Qt = jnp.swapaxes(Qs, -2, -1)          # (B_pad, k, D): canonical matmul layout

    grid = (B_pad // TB, K_pad // TK)
    qt_spec = pl.BlockSpec((TB, k, D), lambda b, j: (b, 0, 0))   # resident over K
    v_spec = pl.BlockSpec((TB, D, TK), lambda b, j: (b, 0, j))   # streamed over K
    out_spec = pl.BlockSpec((TB, 1), lambda b, j: (b, 0))        # resident accumulator
    scratch = [pltpu.VMEM((TB, TK), jnp.float32)]
    compiler_params = pltpu.CompilerParams(
        dimension_semantics=("parallel", "arbitrary"),
        vmem_limit_bytes=int(vmem_limit))
    out_shape = jax.ShapeDtypeStruct((B_pad, 1), jnp.float32)

    if exact:
        q_spec = pl.BlockSpec((TB, D, k), lambda b, j: (b, 0, 0))
        flops = 4 * B * D * k * K + 3 * B * D * K
        per_batch = pl.pallas_call(
            _proj_loss_exact_kernel,
            out_shape=out_shape,
            grid_spec=pltpu.PrefetchScalarGridSpec(
                num_scalar_prefetch=0, grid=grid,
                in_specs=[qt_spec, q_spec, v_spec],
                out_specs=out_spec, scratch_shapes=scratch),
            compiler_params=compiler_params,
            cost_estimate=pl.CostEstimate(
                flops=flops, transcendentals=B * K,
                bytes_accessed=itemsize * (2 * B * D * k + B * D * K) + 4 * B),
        )(Qt, Qs, Vs)
    else:
        Qf = Qs.astype(jnp.float32)
        G = jnp.einsum("bdk,bdj->bkj", Qf, Qf)                   # (B_pad, k, k) f32
        g_spec = pl.BlockSpec((TB, k, k), lambda b, j: (b, 0, 0))
        flops = 2 * B * D * k * K + 2 * B * k * k * K + 3 * B * D * K
        per_batch = pl.pallas_call(
            _proj_loss_gram_kernel,
            out_shape=out_shape,
            grid_spec=pltpu.PrefetchScalarGridSpec(
                num_scalar_prefetch=0, grid=grid,
                in_specs=[qt_spec, g_spec, v_spec],
                out_specs=out_spec, scratch_shapes=scratch),
            compiler_params=compiler_params,
            cost_estimate=pl.CostEstimate(
                flops=flops, transcendentals=B * K,
                bytes_accessed=itemsize * (B * D * k + B * D * K)
                + 4 * B * k * k + 4 * B),
        )(Qt, G, Vs)

    per_batch = per_batch[:B, 0]
    if reduction == "mean":
        return jnp.mean(per_batch)
    elif reduction == "sum":
        return jnp.sum(per_batch)
    # TODO(synk): PyTorch's fallthrough (reduction not in {'mean','sum'}) returns the
    # raw residual tensor V - Q Q^T V; here we return per-batch summed column norms.
    return per_batch


# ---------------------------------------------------------------------------
# Pure-JAX reference (mirrors the PyTorch forward)
# ---------------------------------------------------------------------------
def _projection_loss_ref(Q, V):
    Qt = jnp.swapaxes(Q, -2, -1)
    QtV = jnp.einsum("bkd,bdK->bkK", Qt, V)
    QQtV = jnp.einsum("bdk,bkK->bdK", Q, QtV)
    r = V - QQtV
    norm = jnp.sqrt(jnp.sum(r * r, axis=1))   # p=2, dim=1
    loss = jnp.sum(norm, axis=-1)
    return jnp.mean(loss)


if __name__ == "__main__":
    key = jax.random.PRNGKey(0)
    kq, kv = jax.random.split(key)

    B, D, k, K = 2, 16, 8, 32                 # Q:[B,D,k], V:[B,D,K], K > k
    Q = jax.random.normal(kq, (B, D, k), dtype=jnp.float32)
    V = jax.random.normal(kv, (B, D, K), dtype=jnp.float32)

    ref = jax.block_until_ready(_projection_loss_ref(Q, V))

    out = jax.block_until_ready(projection_loss(Q, V))                # Gram path
    assert jnp.allclose(out, ref, rtol=1e-4, atol=1e-4), (out, ref)

    out_exact = jax.block_until_ready(projection_loss(Q, V, exact=True))
    assert jnp.allclose(out_exact, ref, rtol=1e-4, atol=1e-4), (out_exact, ref)

    print("KERNEL_OK")
</pallas_src>

<mosaic_0001>
module attributes {stable_mosaic.version = 11 : i64} {
  func.func @_proj_loss_gram_kernel(%arg0: i32, %arg1: i32, %arg2: memref<2x8x16xf32, #tpu.memory_space<vmem>>, %arg3: memref<2x8x8xf32, #tpu.memory_space<vmem>>, %arg4: memref<2x16x128xf32, #tpu.memory_space<vmem>>, %arg5: memref<2x1xf32, #tpu.memory_space<vmem>>, %arg6: memref<2x128xf32, #tpu.memory_space<vmem>>) attributes {dimension_semantics = [#tpu.dimension_semantics<parallel>, #tpu.dimension_semantics<arbitrary>], iteration_bounds = array<i64: 1, 1>, scalar_prefetch = 0 : i64, scratch_operands = 1 : i64, tpu.core_type = #tpu.core_type<tc>, window_params = [{transform_indices = @transform_0, window_bounds = array<i64: 2, 8, 16>}, {transform_indices = @transform_1, window_bounds = array<i64: 2, 8, 8>}, {transform_indices = @transform_2, window_bounds = array<i64: 2, 16, 128>}, {transform_indices = @transform_3, window_bounds = array<i64: 2, 1>}]} {
    %c0_i32 = arith.constant 0 : i32
    %0 = arith.cmpi eq, %arg1, %c0_i32 : i32
    %1 = arith.extui %0 : i1 to i32
    %c0_i32_0 = arith.constant 0 : i32
    %2 = arith.cmpi ne, %1, %c0_i32_0 : i32
    scf.if %2 {
      %cst_21 = arith.constant 0.000000e+00 : f32
      %27 = vector.broadcast %cst_21 : f32 to vector<2x128xf32>
      %c0_22 = arith.constant 0 : index
      %c0_23 = arith.constant 0 : index
      %28 = vector.load %arg6[%c0_22, %c0_23] : memref<2x128xf32, #tpu.memory_space<vmem>>, vector<2x128xf32>
      tpu.vector_store %arg6[%c0_22, %c0_23], %27 {strides = array<i32>} : memref<2x128xf32, #tpu.memory_space<vmem>>, vector<2x128xf32>,
    } else {
    }
    %c0 = arith.constant 0 : index
    %c0_1 = arith.constant 0 : index
    %c0_2 = arith.constant 0 : index
    %3 = vector.load %arg2[%c0, %c0_1, %c0_2] : memref<2x8x16xf32, #tpu.memory_space<vmem>>, vector<2x8x16xf32>
    %c0_3 = arith.constant 0 : index
    %c0_4 = arith.constant 0 : index
    %c0_5 = arith.constant 0 : index
    %4 = vector.load %arg4[%c0_3, %c0_4, %c0_5] : memref<2x16x128xf32, #tpu.memory_space<vmem>>, vector<2x16x128xf32>
    "tpu.trace_start"() <{level = 10 : i32, message = "bkd,bdn->bkn"}> : () -> ()
    %cst = arith.constant dense<0.000000e+00> : vector<2x8x128xf32>
    %5 = tpu.matmul %3, %4, %cst {dimension_numbers = #tpu.dot_dimension_numbers<[2], [1], [1], [2], [0, 0, 0, 1, 1, 2], [0], [0]>} : vector<2x8x16xf32>, vector<2x16x128xf32>, vector<2x8x128xf32> -> vector<2x8x128xf32>
    "tpu.trace_stop"() : () -> ()
    %c0_6 = arith.constant 0 : index
    %c0_7 = arith.constant 0 : index
    %c0_8 = arith.constant 0 : index
    %6 = vector.load %arg3[%c0_6, %c0_7, %c0_8] : memref<2x8x8xf32, #tpu.memory_space<vmem>>, vector<2x8x8xf32>
    "tpu.trace_start"() <{level = 10 : i32, message = "bkj,bjn->bkn"}> : () -> ()
    %cst_9 = arith.constant dense<0.000000e+00> : vector<2x8x128xf32>
    %7 = tpu.matmul %6, %5, %cst_9 {dimension_numbers = #tpu.dot_dimension_numbers<[2], [1], [1], [2], [0, 0, 0, 1, 1, 2], [0], [0]>} : vector<2x8x8xf32>, vector<2x8x128xf32>, vector<2x8x128xf32> -> vector<2x8x128xf32>
    "tpu.trace_stop"() : () -> ()
    %8 = arith.mulf %4, %4 : vector<2x16x128xf32>
    %cst_10 = arith.constant dense<0.000000e+00> : vector<2x128xf32>
    %9 = vector.multi_reduction <add>, %8, %cst_10 [1] : vector<2x16x128xf32> to vector<2x128xf32>
    %10 = arith.mulf %5, %5 : vector<2x8x128xf32>
    %cst_11 = arith.constant dense<0.000000e+00> : vector<2x128xf32>
    %11 = vector.multi_reduction <add>, %10, %cst_11 [1] : vector<2x8x128xf32> to vector<2x128xf32>
    %12 = arith.mulf %5, %7 : vector<2x8x128xf32>
    %cst_12 = arith.constant dense<0.000000e+00> : vector<2x128xf32>
    %13 = vector.multi_reduction <add>, %12, %cst_12 [1] : vector<2x8x128xf32> to vector<2x128xf32>
    %cst_13 = arith.constant 2.000000e+00 : f32
    %14 = vector.broadcast %cst_13 : f32 to vector<2x128xf32>
    %15 = arith.mulf %14, %11 : vector<2x128xf32>
    %16 = arith.subf %9, %15 : vector<2x128xf32>
    %17 = arith.addf %16, %13 : vector<2x128xf32>
    %cst_14 = arith.constant 0.000000e+00 : f32
    %18 = vector.broadcast %cst_14 : f32 to vector<2x128xf32>
    %19 = arith.maximumf %17, %18 : vector<2x128xf32>
    %c0_15 = arith.constant 0 : index
    %c0_16 = arith.constant 0 : index
    %20 = vector.load %arg6[%c0_15, %c0_16] : memref<2x128xf32, #tpu.memory_space<vmem>>, vector<2x128xf32>
    %21 = math.sqrt %19 : vector<2x128xf32>
    %22 = arith.addf %20, %21 : vector<2x128xf32>
    %c0_17 = arith.constant 0 : index
    %c0_18 = arith.constant 0 : index
    %23 = vector.load %arg6[%c0_17, %c0_18] : memref<2x128xf32, #tpu.memory_space<vmem>>, vector<2x128xf32>
    tpu.vector_store %arg6[%c0_17, %c0_18], %22 {strides = array<i32>} : memref<2x128xf32, #tpu.memory_space<vmem>>, vector<2x128xf32>,
    %c0_i32_19 = arith.constant 0 : i32
    %24 = arith.cmpi eq, %arg1, %c0_i32_19 : i32
    %25 = arith.extui %24 : i1 to i32
    %c0_i32_20 = arith.constant 0 : i32
    %26 = arith.cmpi ne, %25, %c0_i32_20 : i32
    scf.if %26 {
      %c0_21 = arith.constant 0 : index
      %c0_22 = arith.constant 0 : index
      %27 = vector.load %arg6[%c0_21, %c0_22] : memref<2x128xf32, #tpu.memory_space<vmem>>, vector<2x128xf32>
      %cst_23 = arith.constant dense<0.000000e+00> : vector<2xf32>
      %28 = vector.multi_reduction <add>, %27, %cst_23 [1] : vector<2x128xf32> to vector<2xf32>
      %29 = vector.shape_cast %28 : vector<2xf32> to vector<2x1xf32>
      %c0_24 = arith.constant 0 : index
      %c0_25 = arith.constant 0 : index
      %30 = vector.load %arg5[%c0_24, %c0_25] : memref<2x1xf32, #tpu.memory_space<vmem>>, vector<2x1xf32>
      tpu.vector_store %arg5[%c0_24, %c0_25], %29 {strides = array<i32>} : memref<2x1xf32, #tpu.memory_space<vmem>>, vector<2x1xf32>,
    } else {
    }
    return
  }
  func.func @transform_0(%arg0: i32, %arg1: i32) -> (i32, i32, i32) {
    %c0_i32 = arith.constant 0 : i32
    %c0_i32_0 = arith.constant 0 : i32
    %c0_i32_1 = arith.constant 0 : i32
    return %arg0, %c0_i32, %c0_i32_0 : i32, i32, i32
  }
  func.func @transform_1(%arg0: i32, %arg1: i32) -> (i32, i32, i32) {
    %c0_i32 = arith.constant 0 : i32
    %c0_i32_0 = arith.constant 0 : i32
    %c0_i32_1 = arith.constant 0 : i32
    return %arg0, %c0_i32, %c0_i32_0 : i32, i32, i32
  }
  func.func @transform_2(%arg0: i32, %arg1: i32) -> (i32, i32, i32) {
    %c0_i32 = arith.constant 0 : i32
    %c0_i32_0 = arith.constant 0 : i32
    return %arg0, %c0_i32, %arg1 : i32, i32, i32
  }
  func.func @transform_3(%arg0: i32, %arg1: i32) -> (i32, i32) {
    %c0_i32 = arith.constant 0 : i32
    %c0_i32_0 = arith.constant 0 : i32
    return %arg0, %c0_i32 : i32, i32
  }
}

</mosaic_0001>

<bundles_post_ra>
// kernel: tpu_custom_call.1
= control target key start
LH: loop header
LB: loop body
LE: loop exit
PB: predicated region body
PF: predicated region fallthrough
CT: control target
= control target key end

     0   :  { %8 = vsyncpa [#allocation4], 0  ;;  %s667_s0 = inlined_call_operand.hbm [shape: f32[2,8,16], index: 0, kind: input, shape index: {}]   ;;  %s668_s1 = inlined_call_operand.hbm [shape: f32[2,8,8], index: 1, kind: input, shape index: {}]   ;;  %s669_s2 = inlined_call_operand.hbm [shape: f32[2,16,128], index: 2, kind: input, shape index: {}]   ;;  %s670_s3 = inlined_call_operand.vmem [shape: f32[2,1], index: 3, kind: output, shape index: {}]  }
   0x1   :  { %9 = vsyncpa [#allocation6], 0  ;;  %s580_s12 = smov [#allocation5]   ;;  %s581_s14 = smov [#allocation3]  }
   0x2   :  { %s27_s13 = sshll.u32 %s580_s12, 4  ;;  %s15_s15 = sshll.u32 %s581_s14, 4  ;;  %s28_s13 = int_to_ptr.vmem [resolvable:$true] %s27_s13  ;;  %s608_s15 = int_to_ptr.vmem [resolvable:$true] %s15_s15 }
   0x3   :  { %s510_s18 = scalar_lea.hbm %s668_s1, 256 }
   0x4   :  { %p511_p0 = scmp.ne.s32.totalorder %s668_s1, %s510_s18  ;;  %p514_p1 = scmp.lt.u32.totalorder %s510_s18, %s668_s1 }
   0x6   :  { %p516_p2 = pnand %p514_p1, %p511_p0 }
   0x8   :  { %519 = shalt.err (!%p516_p2)
}
   0x9   :  { %s520_s23 = scalar_lea.vmem %s28_s13, 256  ;;  %p525_p4 = scmp.lt.s32.totalorder %s28_s13, %s28_s13 }
   0xa   :  { %p521_p3 = scmp.ne.s32.totalorder %s28_s13, %s520_s23  ;;  %p526_p5 = scmp.lt.s32.totalorder %s520_s23, %s520_s23 }
   0xc   :  { %p527_p6 = por %p526_p5, %p525_p4 }
   0xe   :  { %p528_p7 = pnand %p527_p6, %p521_p3 }
  0x10   :  { %531 = shalt.err (!%p528_p7)
}
  0x11   :  { %s582_s24 = smov 128   ;;  %s583_s25 = smov 8  }
  0x12   :  { %33 = dma.hbm_to_vmem [thread:$0]  %s668_s1, 256, %s28_s13, [#allocation6], %s582_s24, %s582_s24, %s583_s25  }
  0x13   :  { %s532_s30 = scalar_lea.hbm %s667_s0, 256 }
  0x14   :  { %p533_p8 = scmp.ne.s32.totalorder %s667_s0, %s532_s30  ;;  %p536_p9 = scmp.lt.u32.totalorder %s532_s30, %s667_s0 }
  0x16   :  { %p538_p10 = pnand %p536_p9, %p533_p8 }
  0x18   :  { %541 = shalt.err (!%p538_p10)
}
  0x19   :  { %s542_s8 = scalar_lea.vmem %s608_s15, 256  ;;  %p547_p12 = scmp.lt.s32.totalorder %s608_s15, %s608_s15 }
  0x1a   :  { %p543_p11 = scmp.ne.s32.totalorder %s608_s15, %s542_s8  ;;  %p548_p13 = scmp.lt.s32.totalorder %s542_s8, %s542_s8 }
  0x1c   :  { %p549_p0 = por %p548_p13, %p547_p12 }
  0x1e   :  { %p550_p1 = pnand %p549_p0, %p543_p11 }
  0x20   :  { %553 = shalt.err (!%p550_p1)
}
  0x21   :  { %21 = dma.hbm_to_vmem [thread:$0]  %s667_s0, 256, %s608_s15, [#allocation4], %s582_s24, %s582_s24, %s583_s25  }
  0x22   :  { %s584_s10 = smov [#allocation7]   ;;  %s554_s14 = scalar_lea.hbm %s669_s2, 512 }
  0x23   :  { %s39_s11 = sshll.u32 %s584_s10, 4  ;;  %p555_p2 = scmp.ne.s32.totalorder %s669_s2, %s554_s14  ;;  %s40_s11 = int_to_ptr.vmem [resolvable:$true] %s39_s11 }
  0x24   :  { %p558_p3 = scmp.lt.u32.totalorder %s554_s14, %s669_s2 }
  0x26   :  { %p560_p4 = pnand %p558_p3, %p555_p2 }
  0x28   :  { %563 = shalt.err (!%p560_p4)
}
  0x29   :  { %s564_s20 = scalar_lea.vmem %s40_s11, 512  ;;  %p569_p6 = scmp.lt.s32.totalorder %s40_s11, %s40_s11 }
  0x2a   :  { %p565_p5 = scmp.ne.s32.totalorder %s40_s11, %s564_s20  ;;  %p570_p7 = scmp.lt.s32.totalorder %s564_s20, %s564_s20 }
  0x2c   :  { %p571_p8 = por %p570_p7, %p569_p6 }
  0x2e   :  { %p572_p9 = pnand %p571_p8, %p565_p5 }
  0x30   :  { %575 = shalt.err (!%p572_p9)
}
  0x31   :  { %45 = dma.hbm_to_vmem [thread:$0]  %s669_s2, 512, %s40_s11, [#allocation6], %s582_s24, %s582_s24, %s583_s25  }
  0x32   :  { %576 = dma.done.wait [#allocation4], 256  }
  0x33   :  { %577 = vsyncadd [#allocation4], 4294967040 }
  0x34   :  { %578 = dma.done.wait [#allocation6], 768  }
  0x35   :  { %579 = vsyncadd [#allocation6], 4294966528  ;;  %v585_v0 = vmov 0.0|0.0   ;;  %v586_v1 = vmov 0.0   ;;  %vm587_vm0 = vmmov 0   ;;  %v62_v2 = vld [vmem:[#allocation7] sm:$0xff] }
  0x36   :  { %492 = vmatprep.subr.bf16.mxu0 %v585_v0  ;;  %495 = vmatprep.subr.bf16.mxu1 %v585_v0  ;;  %59 = vst [vmem:[#allocation2] sm:$0x3] %v586_v1  ;;  %v63_v3 = vld [vmem:[#allocation7 + $0x8] sm:$0xff]  ;;  %v64_v4 = vld [vmem:[#allocation7 + $0x10] sm:$0xff]  ;;  %v362_v6 = vmul.f32 %v62_v2, %v62_v2  ;;  %v65_v8 = vld [vmem:[#allocation7 + $0x18] sm:$0xff]  ;;  %vm66_vm1 = vcmask 130048  }
  0x37   :  { %472 = vmatprep.mubr.msk.f32.mxu0 %vm587_vm0, %v586_v1  ;;  %479 = vmatprep.mubr.msk.f32.mxu1 %vm587_vm0, %v586_v1  ;;  %v493_v5 = vpack.c.bf16 %v63_v3, %v62_v2  ;;  %v363_v7 = vmul.f32 %v63_v3, %v63_v3  ;;  %v364_v9 = vmul.f32 %v64_v4, %v64_v4  ;;  %v60_v13 = vld [vmem:[#allocation3] sm:$0xff]  ;;  %v61_v15 = vld [vmem:[#allocation3 + $0x8] sm:$0xff]  ;;  %v213_v20 = vld [vmem:[#allocation5] sm:$0xff]  ;;  %vm215_vm2 = vcmask 64512  }
  0x38   :  { %v496_v10 = vpack.c.bf16 %v65_v8, %v64_v4  ;;  %v365_v11 = vmul.f32 %v65_v8, %v65_v8  ;;  %v214_v22 = vld [vmem:[#allocation5 + $0x8] sm:$0xff]  ;;  %vm433_vm4 = vcmask 1041409   ;;  %vm442_vm8 = vcmask 1041408  }
  0x39   :  { %494 = vmatpush3.bf16.msra.mxu0 %v493_v5  ;;  %v366_v12 = vadd.f32 %v363_v7, %v362_v6  ;;  %vm446_vm9 = vcmask 1024  }
  0x3a   :  { %497 = vmatpush3.bf16.msra.mxu1 %v496_v10  ;;  %v373_v14 = vadd.f32 %v365_v11, %v364_v9  ;;  %482 = vmatprep.subr.mxu0 %v586_v1 }
  0x3b   :  { %487 = vmatprep.subr.mxu1 %v586_v1  ;;  %v367_v16 = vrot.slane %v366_v12, 4 }
  0x3c   :  { %473 = vmatmul.mubr.msk.f32.vlgmr.msra.gmra.mrb[0].mxu0 %vm66_vm1, %v60_v13  ;;  %v374_v17 = vrot.slane %v373_v14, 4 }
  0x3d   :  { %480 = vmatmul.mubr.msk.f32.vlgmr.msra.gmra.mrb[0].mxu1 %vm66_vm1, %v61_v15  ;;  %484 = vmatprep.mubr.msk.f32.mxu0 %vm587_vm0, %v586_v1  ;;  %v368_v18 = vadd.f32 %v367_v16, %v366_v12 }
  0x3e   :  { %489 = vmatprep.mubr.msk.f32.mxu1 %vm587_vm0, %v586_v1  ;;  %v375_v19 = vadd.f32 %v374_v17, %v373_v14 }
  0x3f   :  { %v369_v23 = vrot.slane %v368_v18, 2 }
  0x40   :  { %v376_v27 = vrot.slane %v375_v19, 2 }
  0x41   :  { %v370_v32 = vadd.f32 %v369_v23, %v368_v18  ;;  %v416_v18 = vld [vmem:[#allocation2] sm:$0x3] }
  0x42   :  { %v377_v34 = vadd.f32 %v376_v27, %v375_v19 }
  0x43   :  { %v371_v38 = vrot.slane %v370_v32, 1 }
  0x44   :  { %v378_v40 = vrot.slane %v377_v34, 1 }
  0x45   :  { %v372_v44 = vadd.f32 %v371_v38, %v370_v32 }
  0x46   :  { %v379_v46 = vadd.f32 %v378_v40, %v377_v34 }
 0x10f   :  { %v136_v21 = vpop.f32.mrb[0].mxu0 }
 0x110   :  { %v380_v24 = vmul.f32 %v136_v21, %v136_v21  ;;  %v209_v25 = vpop.f32.mrb[0].mxu1  ;;  %v474_v26 = vpop.f32.mrb[1].mxu0  ;;  %483 = vmatpush3.msra.mxu0 %v136_v21 }
 0x111   :  { %v381_v28 = vmul.f32 %v209_v25, %v209_v25  ;;  %v481_v29 = vpop.f32.mrb[1].mxu1  ;;  %488 = vmatpush3.msra.mxu1 %v209_v25  ;;  %485 = vmatmul.mubr.msk.f32.vlgmr.msra.gmra.mrb[2].mxu0 %vm215_vm2, %v213_v20 }
 0x112   :  { %v382_v30 = vrot.slane %v380_v24, 4  ;;  %490 = vmatmul.mubr.msk.f32.vlgmr.msra.gmra.mrb[2].mxu1 %vm215_vm2, %v214_v22 }
 0x113   :  { %v388_v31 = vrot.slane %v381_v28, 4 }
 0x114   :  { %v383_v33 = vadd.f32 %v382_v30, %v380_v24 }
 0x115   :  { %v389_v35 = vadd.f32 %v388_v31, %v381_v28 }
 0x116   :  { %v384_v36 = vrot.slane %v383_v33, 2 }
 0x117   :  { %v390_v37 = vrot.slane %v389_v35, 2 }
 0x118   :  { %v385_v39 = vadd.f32 %v384_v36, %v383_v33 }
 0x119   :  { %v391_v41 = vadd.f32 %v390_v37, %v389_v35 }
 0x11a   :  { %v386_v42 = vrot.slane %v385_v39, 1 }
 0x11b   :  { %v392_v43 = vrot.slane %v391_v41, 1 }
 0x11c   :  { %v387_v45 = vadd.f32 %v386_v42, %v385_v39 }
 0x11d   :  { %v393_v47 = vadd.f32 %v392_v43, %v391_v41 }
 0x11e   :  { %v408_v48 = vmul.f32 2.0, %v387_v45 }
 0x11f   :  { %v409_v49 = vmul.f32 2.0, %v393_v47 }
 0x120   :  { %v410_v50 = vsub.f32 %v372_v44, %v408_v48 }
 0x121   :  { %v411_v51 = vsub.f32 %v379_v46, %v409_v49 }
 0x1e4   :  { %v285_v52 = vpop.f32.mrb[2].mxu0 }
 0x1e5   :  { %v394_v53 = vmul.f32 %v285_v52, %v136_v21  ;;  %v358_v54 = vpop.f32.mrb[2].mxu1  ;;  %v486_v55 = vpop.f32.mrb[3].mxu0 }
 0x1e6   :  { %v395_v56 = vmul.f32 %v358_v54, %v209_v25  ;;  %v491_v57 = vpop.f32.mrb[3].mxu1 }
 0x1e7   :  { %v396_v58 = vrot.slane %v394_v53, 4 }
 0x1e8   :  { %v402_v59 = vrot.slane %v395_v56, 4 }
 0x1e9   :  { %v397_v60 = vadd.f32 %v396_v58, %v394_v53 }
 0x1ea   :  { %v403_v61 = vadd.f32 %v402_v59, %v395_v56 }
 0x1eb   :  { %v398_v62 = vrot.slane %v397_v60, 2 }
 0x1ec   :  { %v404_v63 = vrot.slane %v403_v61, 2 }
 0x1ed   :  { %v399_v0 = vadd.f32 %v398_v62, %v397_v60 }
 0x1ee   :  { %v405_v1 = vadd.f32 %v404_v63, %v403_v61 }
 0x1ef   :  { %v400_v2 = vrot.slane %v399_v0, 1 }
 0x1f0   :  { %v406_v3 = vrot.slane %v405_v1, 1 }
 0x1f1   :  { %v401_v4 = vadd.f32 %v400_v2, %v399_v0 }
 0x1f2   :  { %v407_v5 = vadd.f32 %v406_v3, %v405_v1 }
 0x1f3   :  { %v412_v6 = vadd.f32 %v410_v50, %v401_v4 }
 0x1f4   :  { %v413_v7 = vadd.f32 %v411_v51, %v407_v5 }
 0x1f5   :  { %v414_v8 = vmax.f32 %v412_v6, 0.0 }
 0x1f6   :  { %v415_v9 = vmax.f32 %v413_v7, 0.0 }
 0x1f7   :  { %506 = vrsqrt.f32 %v414_v8  ;;  %vm419_vm3 = vcmp.eq.f32.partialorder %v414_v8, inf  ;;  %v422_v13 = vand.u32 2147483648, %v414_v8  ;;  %vm421_vm5 = vcmp.eq.f32.partialorder %v414_v8, 0.0 }
 0x1f8   :  { %508 = vrsqrt.f32 %v415_v9  ;;  %vm426_vm6 = vcmp.eq.f32.partialorder %v415_v9, inf  ;;  %v429_v16 = vand.u32 2147483648, %v415_v9  ;;  %vm428_vm7 = vcmp.eq.f32.partialorder %v415_v9, 0.0 }
 0x201   :  { %v507_v10 = vpop.eup %506 }
 0x202   :  { %v509_v11 = vpop.eup %508  ;;  %v418_v12 = vmul.f32 %v507_v10, %v414_v8 }
 0x203   :  { %v425_v14 = vmul.f32 %v509_v11, %v415_v9 }
 0x204   :  { %v420_v15 = vsel %vm419_vm3, %v414_v8, %v418_v12 }
 0x205   :  { %v423_v17 = vsel %vm421_vm5, %v422_v13, %v420_v15  ;;  %v427_v19 = vsel %vm426_vm6, %v415_v9, %v425_v14 }
 0x206   :  { %v430_v20 = vsel %vm428_vm7, %v429_v16, %v427_v19 }
 0x207   :  { %v434_v21 = vsel %vm433_vm4, %v430_v20, %v423_v17 }
 0x208   :  { %v436_v22 = vadd.f32 %v434_v21, %v416_v18 }
 0x20a   :  { %437 = vst [vmem:[#allocation2] sm:$0x3] %v436_v22 }
 0x211   :  { %v441_v23 = vld [vmem:[#allocation2] sm:$0x3] }
 0x212   :  { %v443_v24 = vsel %vm442_vm8, %v441_v23, 0.0 }
 0x213   :  { %444 = vadd.xlane.f32.xlu0 %v443_v24 }
 0x2a0   :  { %v445_v25 = vpop.xlane.xlu0 %444 }
 0x2a1   :  { %447 = vst.msk [vmem:[%s670_s3] sm:$0x3] %vm446_vm9, %v445_v25 }
 0x2a2   :  { %452 = vsyncpa [#allocation4], 1 }
 0x2a3   :  { %453 = vsyncpa [#allocation6], 1 }

</bundles_post_ra>
